<compile_context>
chip_gen: v6e
topology: v6e:2x2x1
jax: 0.10.0
libtpu: 0.0.40
codegen_flags: <defaults>
</compile_context>

<pallas_src>
import functools

import jax
import jax.numpy as jnp
from jax.experimental import pallas as pl
from jax.experimental.pallas import tpu as pltpu


def _round_up(n, m):
    return ((n + m - 1) // m) * m


# ---------------------------------------------------------------------------
# Fused kernel: all LSTM layers (single time-step each) + fll projection
# ---------------------------------------------------------------------------
def _fused_lstm_kernel(num_layers, hidden_size, d_pad,
                       x_ref, w_ref, bw_ref, fllb_ref, o_ref):
    """Ref layout:
         x_ref    (B_pad, d_pad)        f32   VMEM   input, zero-padded
         w_ref    (L, d_pad, G_pad)     bf16  VMEM   stacked input->gate weights,
                                                     gate cols pruned/reordered [i|g|o]
         bw_ref   (L+1, 1, G_pad)       f32   VMEM   rows 0..L-1: per-layer bias (b_ih+b_hh)
                                                     row  L     : fll weight row (first H cols)
         fllb_ref (1,)                  f32   SMEM   fll bias (scalar path)
         o_ref    (B_pad, 1)            f32   VMEM   output
    """
    L, H = num_layers, hidden_size
    h = x_ref[...]                                   # (B, d_pad) f32
    c = None
    for l in range(L):  # static unroll; h/c stay on-chip across layers
        if l > 0 and d_pad > H:                      # only if input_size > hidden_size
            h = jnp.concatenate(
                [h, jnp.zeros((h.shape[0], d_pad - H), h.dtype)], axis=-1)
        # bf16 operands into the MXU (native on v6e/v7x), f32 accumulation.
        gates = (jnp.dot(h.astype(jnp.bfloat16), w_ref[l],
                         preferred_element_type=jnp.float32)
                 + bw_ref[l])                        # (B, G_pad) f32
        # Pruned/reordered gate columns: [i | g | o]  (forget gate is dead: c0 == 0).
        i = jax.nn.sigmoid(gates[:, 0 * H:1 * H])
        g = jnp.tanh(gates[:, 1 * H:2 * H])
        o = jax.nn.sigmoid(gates[:, 2 * H:3 * H])
        c = i * g
        h = o * jnp.tanh(c)
    # fll(c_n of last layer): VPU multiply + lane reduction (no N=1 MXU matmul),
    # scalar bias added from SMEM.
    fll_w = bw_ref[L][:, :H]                         # (1, H) f32
    o_ref[...] = (jnp.sum(c * fll_w, axis=-1, keepdims=True) + fllb_ref[0])


def lstm_model_forward(x, packed, hidden_size, num_layers):
    """Full forward pass of the module in a single fused pallas_call.

    Valid ONLY for the module's forward(): seq_len == 1, h0 == c0 == 0.
    """
    B, input_size = x.shape
    d_pad = packed["w_stack"].shape[1]
    B_pad = _round_up(B, 8)  # fill a whole f32 sublane group; extra rows discarded
    x = jnp.pad(x.astype(jnp.float32),
                ((0, B_pad - B), (0, d_pad - input_size)))

    vmem = pl.BlockSpec(memory_space=pltpu.MemorySpace.VMEM)
    smem = pl.BlockSpec(memory_space=pltpu.MemorySpace.SMEM)

    out = pl.pallas_call(
        functools.partial(_fused_lstm_kernel, num_layers, hidden_size, d_pad),
        out_shape=jax.ShapeDtypeStruct((B_pad, 1), jnp.float32),
        in_specs=[vmem, vmem, vmem, smem],
        out_specs=vmem,
        # TODO(synk): scaling plan (not needed at H=32, B<=8, everything < 32 KiB):
        #  - large batch: grid over the padded batch axis with
        #    dimension_semantics=("parallel",) so both v7x TensorCores get work;
        #    make the output lane-dense ((n, 128+) last dim) to avoid vst.msk stores.
        #  - large hidden: tile the gate axis (N of the matmul) in multiples of 256
        #    (v6e/v7x MXU width; 128 on v5e), keep H a multiple of 128 so gate slices
        #    are vreg-aligned, keep weights bf16, and set
        #    pltpu.CompilerParams(vmem_limit_bytes=...) — v7x has only 64 MiB VMEM
        #    (32 MiB scoped default) and auto-pipelining double-buffers each input.
    )(x, packed["w_stack"], packed["bias_fll_stack"], packed["fll_b"])
    return out[:B, 0]


# ---------------------------------------------------------------------------
# Deterministic parameter initialization (mirrors _initialize_weights),
# kept in PyTorch layout / gate order (i, f, g, o).
# ---------------------------------------------------------------------------
def init_params(key, input_size, hidden_size, num_layers):
    params = {"wih": [], "whh": [], "b_ih": [], "b_hh": []}
    orth = jax.nn.initializers.orthogonal()
    for l in range(num_layers):
        d = input_size if l == 0 else hidden_size
        key, k1, k2 = jax.random.split(key, 3)
        bound = (6.0 / (d + 4 * hidden_size)) ** 0.5          # xavier_uniform (4H, d)
        wih = jax.random.uniform(k1, (4 * hidden_size, d), jnp.float32,
                                 -bound, bound)
        whh = orth(k2, (4 * hidden_size, hidden_size), jnp.float32)  # orthogonal
        params["wih"].append(wih)
        params["whh"].append(whh)
        params["b_ih"].append(jnp.zeros((4 * hidden_size,), jnp.float32))
        params["b_hh"].append(jnp.zeros((4 * hidden_size,), jnp.float32))
    key, k3 = jax.random.split(key)
    bound = (6.0 / (hidden_size + 1)) ** 0.5                  # xavier on (1, H)
    params["fll_w"] = jax.random.uniform(k3, (1, hidden_size), jnp.float32,
                                         -bound, bound)
    params["fll_b"] = jnp.zeros((1,), jnp.float32)
    return params


# ---------------------------------------------------------------------------
# Pack PyTorch-layout params into the kernel's stacked operands:
#  * prune forget-gate columns, reorder to [i | g | o] (3H), pad to 128-lane multiple
#  * pad layer-0 input dim up to d_pad = max(input_size, hidden_size)
#  * weights -> bf16 (MXU operands); biases + fll weight row stay f32
# ---------------------------------------------------------------------------
def pack_params(params, input_size, hidden_size, num_layers):
    H, L = hidden_size, num_layers
    d_pad = max(input_size, H)
    G = 3 * H
    G_pad = _round_up(G, 128)          # full 128-lane MXU tiles (v5e) / no masked lanes

    w_stack, bias_rows = [], []
    for l in range(L):
        wih_t = params["wih"][l].T                                   # (d, 4H) i,f,g,o
        w_igo = jnp.concatenate(
            [wih_t[:, 0:H], wih_t[:, 2 * H:3 * H], wih_t[:, 3 * H:4 * H]], axis=1)
        d = w_igo.shape[0]
        w_igo = jnp.pad(w_igo, ((0, d_pad - d), (0, G_pad - G)))
        w_stack.append(w_igo.astype(jnp.bfloat16))

        b = params["b_ih"][l] + params["b_hh"][l]                    # (4H,)
        b_igo = jnp.concatenate([b[0:H], b[2 * H:3 * H], b[3 * H:4 * H]])
        bias_rows.append(jnp.pad(b_igo, (0, G_pad - G))[None, :])

    fll_row = jnp.pad(params["fll_w"][0], (0, G_pad - H))[None, :]   # (1, G_pad)
    return {
        "w_stack": jnp.stack(w_stack),                               # (L, d_pad, G_pad) bf16
        "bias_fll_stack": jnp.stack(bias_rows + [fll_row]),          # (L+1, 1, G_pad) f32
        "fll_b": params["fll_b"],                                    # (1,) f32  -> SMEM
    }


# ---------------------------------------------------------------------------
# Pure-JAX reference implementing the FULL LSTM math (W_hh, forget gate, c0)
# in f32 at HIGHEST precision, to prove the simplified fused kernel is
# semantics-preserving for the module's forward().
# ---------------------------------------------------------------------------
def reference_forward(x, params, hidden_size, num_layers):
    B, H = x.shape[0], hidden_size
    hi = jax.lax.Precision.HIGHEST
    layer_in = x
    c = None
    for l in range(num_layers):
        h0 = jnp.zeros((B, H), jnp.float32)
        c0 = jnp.zeros((B, H), jnp.float32)
        gates = (jnp.dot(layer_in, params["wih"][l].T, precision=hi)
                 + jnp.dot(h0, params["whh"][l].T, precision=hi)
                 + params["b_ih"][l] + params["b_hh"][l])
        i = jax.nn.sigmoid(gates[:, 0 * H:1 * H])
        f = jax.nn.sigmoid(gates[:, 1 * H:2 * H])
        g = jnp.tanh(gates[:, 2 * H:3 * H])
        o = jax.nn.sigmoid(gates[:, 3 * H:4 * H])
        c = f * c0 + i * g
        layer_in = o * jnp.tanh(c)
    return (jnp.dot(c, params["fll_w"].T, precision=hi) + params["fll_b"])[:, 0]


if __name__ == "__main__":
    batch = 2
    input_size = 8
    hidden_size = 32
    num_layers = 2

    key = jax.random.PRNGKey(0)
    key, kx, kp = jax.random.split(key, 3)
    x = jax.random.normal(kx, (batch, input_size), jnp.float32)
    params = init_params(kp, input_size, hidden_size, num_layers)
    packed = pack_params(params, input_size, hidden_size, num_layers)

    out = lstm_model_forward(x, packed, hidden_size, num_layers)
    out = jax.block_until_ready(out)

    ref = reference_forward(x, params, hidden_size, num_layers)
    assert out.shape == (batch,), out.shape
    # Kernel feeds bf16 operands to the MXU (f32 accumulation); the reference is full
    # fp32 HIGHEST precision, so compare at bf16-operand tolerance.
    assert jnp.allclose(out, ref, atol=1e-2, rtol=1e-2), (out, ref)

    print("KERNEL_OK")
</pallas_src>

<mosaic_0001>
module attributes {stable_mosaic.version = 11 : i64} {
  func.func @_fused_lstm_kernel(%arg0: memref<8x32xf32, #tpu.memory_space<vmem>>, %arg1: memref<2x32x128xbf16, #tpu.memory_space<vmem>>, %arg2: memref<3x1x128xf32, #tpu.memory_space<vmem>>, %arg3: memref<1xf32, #tpu.memory_space<smem>>, %arg4: memref<8x1xf32, #tpu.memory_space<vmem>>) attributes {dimension_semantics = [], scalar_prefetch = 0 : i64, scratch_operands = 0 : i64, tpu.core_type = #tpu.core_type<tc>} {
    %c0 = arith.constant 0 : index
    %c0_0 = arith.constant 0 : index
    %0 = vector.load %arg0[%c0, %c0_0] : memref<8x32xf32, #tpu.memory_space<vmem>>, vector<8x32xf32>
    %1 = arith.truncf %0 : vector<8x32xf32> to vector<8x32xbf16>
    %c0_1 = arith.constant 0 : index
    %c0_2 = arith.constant 0 : index
    %c0_3 = arith.constant 0 : index
    %2 = vector.load %arg1[%c0_1, %c0_2, %c0_3] : memref<2x32x128xbf16, #tpu.memory_space<vmem>>, vector<1x32x128xbf16>
    %3 = vector.shape_cast %2 : vector<1x32x128xbf16> to vector<32x128xbf16>
    %cst = arith.constant dense<0.000000e+00> : vector<8x128xf32>
    %4 = tpu.matmul %1, %3, %cst {dimension_numbers = #tpu.dot_dimension_numbers<[1], [0], [0], [1], [0, 0, 1, 1], [], []>} : vector<8x32xbf16>, vector<32x128xbf16>, vector<8x128xf32> -> vector<8x128xf32>
    %c0_4 = arith.constant 0 : index
    %c0_5 = arith.constant 0 : index
    %c0_6 = arith.constant 0 : index
    %5 = vector.load %arg2[%c0_4, %c0_5, %c0_6] : memref<3x1x128xf32, #tpu.memory_space<vmem>>, vector<1x1x128xf32>
    %6 = vector.shape_cast %5 : vector<1x1x128xf32> to vector<1x128xf32>
    %7 = vector.broadcast %6 : vector<1x128xf32> to vector<8x128xf32>
    %8 = arith.addf %4, %7 : vector<8x128xf32>
    %9 = vector.extract_strided_slice %8 {offsets = [0, 0], sizes = [8, 32], strides = [1, 1]} : vector<8x128xf32> to vector<8x32xf32>
    %10 = arith.negf %9 : vector<8x32xf32>
    %11 = math.exp %10 : vector<8x32xf32>
    %cst_7 = arith.constant 1.000000e+00 : f32
    %12 = vector.broadcast %cst_7 : f32 to vector<8x32xf32>
    %13 = arith.addf %12, %11 : vector<8x32xf32>
    %14 = arith.divf %12, %13 : vector<8x32xf32>
    %15 = vector.extract_strided_slice %8 {offsets = [0, 32], sizes = [8, 32], strides = [1, 1]} : vector<8x128xf32> to vector<8x32xf32>
    %16 = math.tanh %15 : vector<8x32xf32>
    %17 = vector.extract_strided_slice %8 {offsets = [0, 64], sizes = [8, 32], strides = [1, 1]} : vector<8x128xf32> to vector<8x32xf32>
    %18 = arith.negf %17 : vector<8x32xf32>
    %19 = math.exp %18 : vector<8x32xf32>
    %cst_8 = arith.constant 1.000000e+00 : f32
    %20 = vector.broadcast %cst_8 : f32 to vector<8x32xf32>
    %21 = arith.addf %20, %19 : vector<8x32xf32>
    %22 = arith.divf %20, %21 : vector<8x32xf32>
    %23 = arith.mulf %14, %16 : vector<8x32xf32>
    %24 = math.tanh %23 : vector<8x32xf32>
    %25 = arith.mulf %22, %24 : vector<8x32xf32>
    %26 = arith.truncf %25 : vector<8x32xf32> to vector<8x32xbf16>
    %c1 = arith.constant 1 : index
    %c0_9 = arith.constant 0 : index
    %c0_10 = arith.constant 0 : index
    %27 = vector.load %arg1[%c1, %c0_9, %c0_10] : memref<2x32x128xbf16, #tpu.memory_space<vmem>>, vector<1x32x128xbf16>
    %28 = vector.shape_cast %27 : vector<1x32x128xbf16> to vector<32x128xbf16>
    %cst_11 = arith.constant dense<0.000000e+00> : vector<8x128xf32>
    %29 = tpu.matmul %26, %28, %cst_11 {dimension_numbers = #tpu.dot_dimension_numbers<[1], [0], [0], [1], [0, 0, 1, 1], [], []>} : vector<8x32xbf16>, vector<32x128xbf16>, vector<8x128xf32> -> vector<8x128xf32>
    %c1_12 = arith.constant 1 : index
    %c0_13 = arith.constant 0 : index
    %c0_14 = arith.constant 0 : index
    %30 = vector.load %arg2[%c1_12, %c0_13, %c0_14] : memref<3x1x128xf32, #tpu.memory_space<vmem>>, vector<1x1x128xf32>
    %31 = vector.shape_cast %30 : vector<1x1x128xf32> to vector<1x128xf32>
    %32 = vector.broadcast %31 : vector<1x128xf32> to vector<8x128xf32>
    %33 = arith.addf %29, %32 : vector<8x128xf32>
    %34 = vector.extract_strided_slice %33 {offsets = [0, 0], sizes = [8, 32], strides = [1, 1]} : vector<8x128xf32> to vector<8x32xf32>
    %35 = arith.negf %34 : vector<8x32xf32>
    %36 = math.exp %35 : vector<8x32xf32>
    %cst_15 = arith.constant 1.000000e+00 : f32
    %37 = vector.broadcast %cst_15 : f32 to vector<8x32xf32>
    %38 = arith.addf %37, %36 : vector<8x32xf32>
    %39 = arith.divf %37, %38 : vector<8x32xf32>
    %40 = vector.extract_strided_slice %33 {offsets = [0, 32], sizes = [8, 32], strides = [1, 1]} : vector<8x128xf32> to vector<8x32xf32>
    %41 = math.tanh %40 : vector<8x32xf32>
    %42 = arith.mulf %39, %41 : vector<8x32xf32>
    %c2 = arith.constant 2 : index
    %c0_16 = arith.constant 0 : index
    %c0_17 = arith.constant 0 : index
    %43 = vector.load %arg2[%c2, %c0_16, %c0_17] : memref<3x1x128xf32, #tpu.memory_space<vmem>>, vector<1x1x128xf32>
    %44 = vector.shape_cast %43 : vector<1x1x128xf32> to vector<1x128xf32>
    %45 = vector.extract_strided_slice %44 {offsets = [0, 0], sizes = [1, 32], strides = [1, 1]} : vector<1x128xf32> to vector<1x32xf32>
    %46 = vector.broadcast %45 : vector<1x32xf32> to vector<8x32xf32>
    %47 = arith.mulf %42, %46 : vector<8x32xf32>
    %cst_18 = arith.constant dense<0.000000e+00> : vector<8xf32>
    %48 = vector.multi_reduction <add>, %47, %cst_18 [1] : vector<8x32xf32> to vector<8xf32>
    %49 = vector.shape_cast %48 : vector<8xf32> to vector<8x1xf32>
    %c0_19 = arith.constant 0 : index
    %50 = memref.load %arg3[%c0_19] : memref<1xf32, #tpu.memory_space<smem>>
    %51 = vector.broadcast %50 : f32 to vector<8x1xf32>
    %52 = arith.addf %49, %51 : vector<8x1xf32>
    %c0_20 = arith.constant 0 : index
    %c0_21 = arith.constant 0 : index
    %53 = vector.load %arg4[%c0_20, %c0_21] : memref<8x1xf32, #tpu.memory_space<vmem>>, vector<8x1xf32>
    tpu.vector_store %arg4[%c0_20, %c0_21], %52 {strides = array<i32>} : memref<8x1xf32, #tpu.memory_space<vmem>>, vector<8x1xf32>,
    return
  }
}

</mosaic_0001>

<bundles_post_ra>
// kernel: tpu_custom_call.1
= control target key start
LH: loop header
LB: loop body
LE: loop exit
PB: predicated region body
PF: predicated region fallthrough
CT: control target
= control target key end

     0   :  { %10 = vsyncpa [#allocation4], 0  ;;  %s405_s0 = inlined_call_operand.hbm [shape: f32[8,32], index: 0, kind: input, shape index: {}]   ;;  %s406_s1 = inlined_call_operand.hbm [shape: bf16[2,32,128], index: 1, kind: input, shape index: {}]   ;;  %s407_s2 = inlined_call_operand.vmem [shape: f32[3,1,128], index: 2, kind: input, shape index: {}]   ;;  %s408_s3 = inlined_call_operand.<no memory space> [shape: f32[1], index: 3, kind: input, shape index: {}]   ;;  %s409_s4 = inlined_call_operand.vmem [shape: f32[8,1], index: 4, kind: output, shape index: {}]  }
   0x1   :  { %11 = vsyncpa [#allocation6], 0  ;;  %s343_s15 = smov [#allocation3]   ;;  %s344_s17 = smov [#allocation5]  }
   0x2   :  { %s18_s16 = sshll.u32 %s343_s15, 4  ;;  %s27_s18 = sshll.u32 %s344_s17, 4  ;;  %s19_s16 = int_to_ptr.vmem [resolvable:$true] %s18_s16  ;;  %s28_s18 = int_to_ptr.vmem [resolvable:$true] %s27_s18 }
   0x3   :  { %s307_s19 = scalar_lea.vmem %s19_s16, 128  ;;  %p312_p1 = scmp.lt.s32.totalorder %s19_s16, %s19_s16 }
   0x4   :  { %p308_p0 = scmp.ne.s32.totalorder %s19_s16, %s307_s19  ;;  %p313_p2 = scmp.lt.s32.totalorder %s307_s19, %s307_s19 }
   0x6   :  { %p314_p3 = por %p313_p2, %p312_p1 }
   0x8   :  { %p315_p4 = pnand %p314_p3, %p308_p0 }
   0xa   :  { %318 = shalt.err (!%p315_p4)
}
   0xb   :  { %21 = dma.hbm_to_vmem [thread:$0]  %s405_s0, 128, %s19_s16, [#allocation4]  }
   0xc   :  { %s327_s22 = scalar_lea.vmem %s28_s18, 512  ;;  %p332_p6 = scmp.lt.s32.totalorder %s28_s18, %s28_s18 }
   0xd   :  { %p328_p5 = scmp.ne.s32.totalorder %s28_s18, %s327_s22  ;;  %p333_p7 = scmp.lt.s32.totalorder %s327_s22, %s327_s22 }
   0xf   :  { %p334_p8 = por %p333_p7, %p332_p6 }
  0x11   :  { %p335_p9 = pnand %p334_p8, %p328_p5 }
  0x13   :  { %338 = shalt.err (!%p335_p9)
}
  0x14   :  { %s345_s23 = smov 64   ;;  %s346_s24 = smov 4  }
  0x15   :  { %33 = dma.hbm_to_vmem [thread:$0]  %s406_s1, 512, %s28_s18, [#allocation6], %s345_s23, %s345_s23, %s346_s24  }
  0x16   :  { %339 = dma.done.wait [#allocation4], 128  }
  0x17   :  { %340 = vsyncadd [#allocation4], 4294967168 }
  0x18   :  { %341 = dma.done.wait [#allocation6], 512  }
  0x19   :  { %342 = vsyncadd [#allocation6], 4294966784  ;;  %v347_v0 = vmov 0.0   ;;  %vm348_vm0 = vmmov 0   ;;  %v281_v1 = vld [vmem:[#allocation5 + $0x8] sm:$0xff]   ;;  %v282_v2 = vld [vmem:[#allocation5] sm:$0xff]   ;;  %v229_v41 = vstv %s408_s3 }
  0x1a   :  { %258 = vmatprep.subr.bf16.mxu0 %v347_v0  ;;  %262 = vmatprep.mubr.msk.bf16.mxu0 %vm348_vm0, %v347_v0  ;;  %v45_v3 = vld [vmem:[#allocation3] sm:$0xff]  ;;  %vm70_vm1 = vcmask 261120   ;;  %s349_s27 = smov 96   ;;  %v284_v19 = vld [vmem:[#allocation5 + $0x10] sm:$0xff]   ;;  %vm231_vm2 = vcmask 7168  }
  0x1b   :  { %266 = vmatprep.subr.bf16.mxu1 %v347_v0  ;;  %270 = vmatprep.mubr.msk.bf16.mxu1 %vm348_vm0, %v347_v0  ;;  %v46_v4 = vpack.c.bf16 %v45_v3, %v45_v3  ;;  %v239_v5 = vld [vmem:[%s407_s2] ss:$0 sm:$0xff]  ;;  %v245_v25 = vld [vmem:[%s407_s2 + $0x1] ss:$0 sm:$0xff]  ;;  %v251_v37 = vld [vmem:[%s407_s2 + $0x2] ss:$0 sm:$0xff] }
  0x1c   :  { %259 = vmatpush3.bf16.msra.mxu0 %v281_v1  ;;  %v283_v18 = vld [vmem:[#allocation5 + $0x18] sm:$0xff]  }
  0x1d   :  { %260 = vmatprep.subr.bf16.mxu0 %v347_v0  ;;  %267 = vmatpush3.bf16.msra.mxu1 %v283_v18 }
  0x1e   :  { %268 = vmatprep.subr.bf16.mxu1 %v347_v0 }
  0x20   :  { %261 = vmatpush3.bf16.msra.mxu0 %v282_v2 }
  0x21   :  { %269 = vmatpush3.bf16.msra.mxu1 %v284_v19 }
  0x23   :  { %263 = vmatmul.mubr.msk.bf16.vlgmr.msra.gmra.mxu0 %vm70_vm1, %v46_v4 }
  0xe3   :  { %v108_v6 = vpop.f32.mrf.mxu0 }
  0xe4   :  { %v109_v7 = vadd.f32 %v239_v5, %v108_v6 }
  0xe5   :  { %v264_v8 = vpop.f32.mrf.mxu0 }
  0xe6   :  { %285 = vtanh.f32 %v109_v7  ;;  %v243_v12 = vmul.f32 -1.442695, %v109_v7 }
  0xe7   :  { %v111_v9 = vpop.f32.mrf.mxu0 }
  0xe8   :  { %287 = vpow2.f32 %v243_v12 }
  0xe9   :  { %v265_v10 = vpop.f32.mrf.mxu0 }
  0xf3   :  { %v286_v11 = vpop.eup %285 }
  0xf4   :  { %122 = vrot.lane.b32.xlu0 %v286_v11, %s349_s27 }
  0xf5   :  { %v288_v13 = vpop.eup %287 }
  0xf6   :  { %v117_v14 = vadd.f32 1.0, %v288_v13 }
  0xf8   :  { %289 = vrcp.f32 %v117_v14 }
 0x105   :  { %v290_v15 = vpop.eup %289 }
 0x166   :  { %v123_v16 = vpop.permute.xlu0 %122 }
 0x167   :  { %v125_v17 = vmul.f32 %v290_v15, %v123_v16 }
 0x169   :  { %291 = vtanh.f32 %v125_v17 }
 0x176   :  { %v292_v20 = vpop.eup %291 }
 0x177   :  { %128 = vrot.lane.b32.xlu0 %v292_v20, %s345_s23 }
 0x1e9   :  { %v129_v21 = vpop.permute.xlu0 %128 }
 0x1ea   :  { %v131_v22 = vmul.f32 %v290_v15, %v129_v21 }
 0x1ec   :  { %v132_v23 = vpack.c.bf16 %v131_v22, %v131_v22 }
 0x1ee   :  { %147 = vrot.lane.b32.xlu1 %v132_v23, %s345_s23 }
 0x260   :  { %v148_v24 = vpop.permute.xlu1 %147 }
 0x261   :  { %271 = vmatmul.mubr.msk.bf16.vlgmr.msra.gmra.mxu1 %vm70_vm1, %v148_v24 }
 0x321   :  { %v198_v26 = vpop.f32.mrf.mxu1 }
 0x322   :  { %v199_v27 = vadd.f32 %v245_v25, %v198_v26 }
 0x323   :  { %v272_v28 = vpop.f32.mrf.mxu1 }
 0x324   :  { %293 = vtanh.f32 %v199_v27  ;;  %v249_v32 = vmul.f32 -1.442695, %v199_v27 }
 0x325   :  { %v201_v29 = vpop.f32.mrf.mxu1 }
 0x326   :  { %295 = vpow2.f32 %v249_v32 }
 0x327   :  { %v273_v30 = vpop.f32.mrf.mxu1 }
 0x331   :  { %v294_v31 = vpop.eup %293 }
 0x332   :  { %212 = vrot.lane.b32.xlu1 %v294_v31, %s349_s27 }
 0x333   :  { %v296_v33 = vpop.eup %295 }
 0x334   :  { %v207_v34 = vadd.f32 1.0, %v296_v33 }
 0x336   :  { %297 = vrcp.f32 %v207_v34 }
 0x343   :  { %v298_v35 = vpop.eup %297 }
 0x3a4   :  { %v213_v36 = vpop.permute.xlu1 %212 }
 0x3a5   :  { %v215_v38 = vmul.f32 %v298_v35, %v213_v36 }
 0x3a7   :  { %v224_v39 = vmul.f32 %v251_v37, %v215_v38 }
 0x3a9   :  { %v225_v40 = vsel %vm70_vm1, %v224_v39, 0.0 }
 0x3aa   :  { %226 = vadd.xlane.f32.xlu0 %v225_v40 }
 0x433   :  { %v227_v42 = vpop.xlane.xlu0 %226 }
 0x434   :  { %v230_v43 = vadd.f32 %v229_v41, %v227_v42 }
 0x436   :  { %232 = vst.msk [vmem:[%s409_s4] sm:$0xff] %vm231_vm2, %v230_v43 }
 0x437   :  { %237 = vsyncpa [#allocation4], 1 }
 0x438   :  { %238 = vsyncpa [#allocation6], 1 }

</bundles_post_ra>
